<compile_context>
chip_gen: v5e
topology: v5e:2x2
jax: 0.10.0
libtpu: 0.0.40
codegen_flags: <defaults>
</compile_context>

<pallas_src>
import jax
import jax.numpy as jnp
from jax.experimental import pallas as pl
from jax.experimental.pallas import tpu as pltpu

LANES = 128
_SUBLANES = 8


def _default_tile_rows_target():
    """Rows of 128 lanes streamed per grid step (per input).

    4096 rows = 2 MiB/input f32 tile: DMA time comfortably dominates the per-step
    overhead on v5e/v6e.  v7x's 3.2 TB/s HBM wants 8192 rows (4 MiB/input, 16 MiB
    total double-buffered, well inside its 64 MiB physical VMEM).
    """
    try:
        kind = jax.devices()[0].device_kind.lower()
    except Exception:  # no accelerator visible at trace time
        return 4096
    if "v7" in kind or "7x" in kind:
        return 8192
    return 4096


def _make_in_index_map(nsplit, inner_blocks, row_blocks):
    """Input index map: grid (class, q, j) -> block (batch_chunk, class, row_block, 0)."""
    if nsplit == 1:
        return lambda c, q, j: (q, c, j, 0)
    last = row_blocks - 1

    def index_map(c, q, j):
        rb = (q % nsplit) * inner_blocks + j
        # Clamp possible "ghost" blocks (odd row_blocks split 2 ways) to stay in bounds;
        # the kernel masks their contribution to zero.
        return (q // nsplit, c, jnp.minimum(rb, last), 0)

    return index_map


def _make_kernel(*, bn, tile_rows, rows, n_batch, nsplit, inner_blocks, row_blocks):
    """Build the per-block kernel with static tile geometry baked in."""
    fold = (tile_rows % _SUBLANES) == 0               # pure-VPU accumulate path
    batch_chunks = -(-n_batch // bn)
    # At most one edge kind can be live: bn > 1 implies tile_rows == rows (single row block).
    row_edge = (bn == 1) and ((rows % tile_rows != 0) or (nsplit * inner_blocks != row_blocks))
    batch_edge = (bn > 1) and (n_batch % bn != 0)

    def kernel(x_ref, t_ref, out_ref):
        j = pl.program_id(2)                          # reduction axis (innermost)

        @pl.when(j == 0)
        def _init():
            out_ref[...] = jnp.zeros_like(out_ref)

        x = x_ref[:, 0].astype(jnp.float32)           # (bn, tile_rows, LANES)
        t = t_ref[:, 0].astype(jnp.float32)

        def accumulate(xv, tv):
            pos = tv > 0.5                            # one compare reused by both sums
            inter = jnp.where(pos, xv, 0.0)           # x * (t > 0.5)
            total = xv + jnp.where(pos, 1.0, 0.0)     # x + (t > 0.5)
            if fold:
                # (bn*tile_rows, 128) -> (., 8, 128): layout-preserving reshape + pure
                # VPU vreg adds, unmasked full-lane stores into the resident accumulator.
                out_ref[0, 0, 0] += inter.reshape(-1, _SUBLANES, LANES).sum(axis=0)
                out_ref[0, 0, 1] += total.reshape(-1, _SUBLANES, LANES).sum(axis=0)
            else:
                # Tiny-image fallback (< 8 rows of 128 lanes per sample).
                out_ref[0, 0, 0, 0:1, :] += inter.sum(axis=0).sum(axis=0, keepdims=True)
                out_ref[0, 0, 1, 0:1, :] += total.sum(axis=0).sum(axis=0, keepdims=True)

        if not (row_edge or batch_edge):
            accumulate(x, t)
        else:
            q = pl.program_id(1)
            if row_edge:
                s = (q % nsplit) if nsplit > 1 else 0
                row_start = (s * inner_blocks + j) * tile_rows
                is_edge = row_start + tile_rows > rows
            else:
                is_edge = q == (batch_chunks - 1)

            @pl.when(jnp.logical_not(is_edge))
            def _full():
                accumulate(x, t)

            @pl.when(is_edge)
            def _masked():
                if row_edge:
                    idx = jax.lax.broadcasted_iota(jnp.int32, (bn, tile_rows, LANES), 1)
                    valid = (row_start + idx) < rows
                else:
                    idx = jax.lax.broadcasted_iota(jnp.int32, (bn, tile_rows, LANES), 0)
                    valid = (q * bn + idx) < n_batch
                accumulate(jnp.where(valid, x, 0.0), jnp.where(valid, t, 0.0))

    return kernel


def jaccard_loss(predict, target, num_classes=2, weight=(0.5, 0.5), smooth=1.0,
                 tile_rows_target=None, buffers_per_input=2):
    """Pallas implementation of JaccardLoss.forward (weighted per-class binary IoU loss)."""
    assert predict.shape == target.shape
    n, c = predict.shape[0], predict.shape[1]
    assert c >= num_classes

    hw = 1
    for d in predict.shape[2:]:
        hw *= d

    p = predict.reshape(n, c, hw)      # free (contiguous) reshape, native dtype
    t = target.reshape(n, c, hw)

    rows = hw // LANES                 # full 128-lane blocks streamed by the kernel
    tail = hw - rows * LANES           # <128-element remainder handled in the epilogue

    inter = jnp.zeros((num_classes,), jnp.float32)
    total = jnp.zeros((num_classes,), jnp.float32)

    if rows > 0:
        if tile_rows_target is None:
            tile_rows_target = _default_tile_rows_target()
        tile_rows_target = max(_SUBLANES, (tile_rows_target // _SUBLANES) * _SUBLANES)

        # ---- block geometry ------------------------------------------------------
        bn = 1
        if n > 1 and rows < tile_rows_target:
            # Small images: fold several batch elements per block so each grid step
            # still moves ~tile_rows_target * 128 elements per input.
            bn = min(n, max(1, tile_rows_target // rows))
        if bn > 1:
            tile_rows = rows                                   # full spatial extent/sample
        elif rows > _SUBLANES:
            tile_rows = min(tile_rows_target, rows - rows % _SUBLANES)  # multiple of 8
        else:
            tile_rows = rows
        row_blocks = -(-rows // tile_rows)
        batch_chunks = -(-n // bn)

        # 2-way split of the reduction axis into separate accumulator slabs when the
        # parallel work (classes x batch chunks) is too small/odd for v7x's 2 TCs.
        par_work = num_classes * batch_chunks
        nsplit = 2 if (bn == 1 and row_blocks >= 2 and (par_work < 4 or par_work % 2 == 1)) else 1
        inner_blocks = -(-row_blocks // nsplit)

        grid = (num_classes, batch_chunks * nsplit, inner_blocks)

        if tail:
            # Rare path (hw % 128 != 0): stream only the full lane blocks; the tail is
            # added below in plain JAX (no full-tensor pad copy).
            p_main = p[:, :, : rows * LANES].reshape(n, c, rows, LANES)
            t_main = t[:, :, : rows * LANES].reshape(n, c, rows, LANES)
        else:
            p_main = p.reshape(n, c, rows, LANES)
            t_main = t.reshape(n, c, rows, LANES)

        block = (bn, 1, tile_rows, LANES)
        in_map = _make_in_index_map(nsplit, inner_blocks, row_blocks)
        if buffers_per_input != 2:
            # Optional deeper pipelining (worth a few % on v6e/v7x once near roofline).
            in_spec = pl.BlockSpec(block, in_map, pipeline_mode=pl.Buffered(buffers_per_input))
        else:
            in_spec = pl.BlockSpec(block, in_map)
        out_spec = pl.BlockSpec((1, 1, 2, _SUBLANES, LANES),
                                lambda cc, qq, jj: (cc, qq, 0, 0, 0))

        # Explicit scoped-VMEM budget: 2 inputs x buffers x block + slack.  Needed for
        # v5e's 16 MiB scoped default once tiles reach 2-4 MiB; capped at 64 MiB (v7x).
        block_bytes = bn * tile_rows * LANES * (predict.dtype.itemsize + target.dtype.itemsize)
        vmem_needed = block_bytes * max(2, buffers_per_input) + (4 << 20)
        vmem_limit = int(min(64 << 20, max(32 << 20, 2 * vmem_needed)))

        sums = pl.pallas_call(
            _make_kernel(bn=bn, tile_rows=tile_rows, rows=rows, n_batch=n,
                         nsplit=nsplit, inner_blocks=inner_blocks, row_blocks=row_blocks),
            out_shape=jax.ShapeDtypeStruct(
                (num_classes, batch_chunks * nsplit, 2, _SUBLANES, LANES), jnp.float32),
            grid_spec=pltpu.PrefetchScalarGridSpec(
                num_scalar_prefetch=0,
                grid=grid,
                in_specs=[in_spec, in_spec],
                out_specs=out_spec,
            ),
            compiler_params=pltpu.CompilerParams(
                dimension_semantics=("parallel", "parallel", "arbitrary"),
                vmem_limit_bytes=vmem_limit,
            ),
        )(p_main, t_main)

        # Cheap epilogue: one cross-lane reduce per class.
        inter = jnp.sum(sums[:, :, 0], axis=(1, 2, 3))    # (num_classes,)
        total = jnp.sum(sums[:, :, 1], axis=(1, 2, 3))    # (num_classes,)

    if tail:
        p_tail = p[:, :num_classes, rows * LANES:].astype(jnp.float32)  # (n, nc, tail)
        t_tail = t[:, :num_classes, rows * LANES:]
        pos = (t_tail > 0.5).astype(jnp.float32)
        inter = inter + jnp.sum(p_tail * pos, axis=(0, 2))
        total = total + jnp.sum(p_tail + pos, axis=(0, 2))

    union = total - inter
    iou = (inter + smooth) / (union + smooth)
    w = jnp.asarray(weight, dtype=jnp.float32)[:num_classes]
    return jnp.sum(w * (1.0 - iou))


def _reference(predict, target, num_classes=2, weight=(0.5, 0.5), smooth=1.0):
    """Pure-JAX replica of the PyTorch JaccardLoss.forward."""
    tgt = (target > 0.5).astype(jnp.float32)
    total_loss = 0.0
    for i in range(num_classes):
        x = predict[:, i].reshape(-1).astype(jnp.float32)
        y = tgt[:, i].reshape(-1)
        inter = jnp.sum(x * y)
        tot = jnp.sum(x + y)
        union = tot - inter
        iou = (inter + smooth) / (union + smooth)
        total_loss = total_loss + weight[i] * (1.0 - iou)
    return total_loss


if __name__ == "__main__":
    root = jax.random.PRNGKey(0)
    num_classes = 2

    cases = [
        # (shape, dtype, kwargs) -- all small; chosen to exercise every kernel path.
        ((2, 2, 16, 16), jnp.float32, {}),                          # batch-fold, tiny-rows path
        ((3, 2, 8, 128), jnp.float32, {"tile_rows_target": 16}),    # batch-fold + partial batch chunk
        ((1, 2, 8, 448), jnp.float32, {"tile_rows_target": 8}),     # multi row blocks + 2-way split + row mask
        ((1, 2, 8, 384), jnp.float32, {"tile_rows_target": 8}),     # 2-way split with a ghost block
        ((2, 3, 12, 12), jnp.bfloat16, {}),                         # bf16 input, extra channel, hw%128 tail
    ]

    for i, (shape, dtype, kw) in enumerate(cases):
        k1, k2 = jax.random.split(jax.random.fold_in(root, i))
        predict = jax.nn.softmax(
            jax.random.normal(k1, shape, jnp.float32), axis=1).astype(dtype)
        target = jax.random.uniform(k2, shape, jnp.float32).astype(dtype)

        loss = jax.block_until_ready(
            jaccard_loss(predict, target, num_classes=num_classes, **kw))
        ref = jax.block_until_ready(
            _reference(predict, target, num_classes=num_classes))
        assert jnp.allclose(loss, ref, rtol=1e-4, atol=1e-5), (shape, str(dtype), loss, ref)

    print("KERNEL_OK")
</pallas_src>

<mosaic_0001>
module attributes {stable_mosaic.version = 11 : i64} {
  func.func @kernel(%arg0: i32, %arg1: i32, %arg2: i32, %arg3: memref<2x1x2x128xf32, #tpu.memory_space<vmem>>, %arg4: memref<2x1x2x128xf32, #tpu.memory_space<vmem>>, %arg5: memref<1x1x2x8x128xf32, #tpu.memory_space<vmem>>) attributes {dimension_semantics = [#tpu.dimension_semantics<parallel>, #tpu.dimension_semantics<parallel>, #tpu.dimension_semantics<arbitrary>], iteration_bounds = array<i64: 2, 1, 1>, scalar_prefetch = 0 : i64, scratch_operands = 0 : i64, tpu.core_type = #tpu.core_type<tc>, window_params = [{transform_indices = @transform_0, window_bounds = array<i64: 2, 1, 2, 128>}, {transform_indices = @transform_1, window_bounds = array<i64: 2, 1, 2, 128>}, {transform_indices = @transform_2, window_bounds = array<i64: 1, 1, 2, 8, 128>}]} {
    %c0_i32 = arith.constant 0 : i32
    %0 = arith.cmpi eq, %arg2, %c0_i32 : i32
    %1 = arith.extui %0 : i1 to i32
    %c0_i32_0 = arith.constant 0 : i32
    %2 = arith.cmpi ne, %1, %c0_i32_0 : i32
    scf.if %2 {
      %cst_34 = arith.constant 0.000000e+00 : f32
      %33 = vector.broadcast %cst_34 : f32 to vector<1x1x2x8x128xf32>
      %c0_35 = arith.constant 0 : index
      %c0_36 = arith.constant 0 : index
      %c0_37 = arith.constant 0 : index
      %c0_38 = arith.constant 0 : index
      %c0_39 = arith.constant 0 : index
      %34 = vector.load %arg5[%c0_35, %c0_36, %c0_37, %c0_38, %c0_39] : memref<1x1x2x8x128xf32, #tpu.memory_space<vmem>>, vector<1x1x2x8x128xf32>
      tpu.vector_store %arg5[%c0_35, %c0_36, %c0_37, %c0_38, %c0_39], %33 {strides = array<i32>} : memref<1x1x2x8x128xf32, #tpu.memory_space<vmem>>, vector<1x1x2x8x128xf32>,
    } else {
    }
    %c0 = arith.constant 0 : index
    %c0_1 = arith.constant 0 : index
    %c0_2 = arith.constant 0 : index
    %c0_3 = arith.constant 0 : index
    %3 = vector.load %arg3[%c0, %c0_1, %c0_2, %c0_3] : memref<2x1x2x128xf32, #tpu.memory_space<vmem>>, vector<2x1x2x128xf32>
    %4 = vector.shape_cast %3 : vector<2x1x2x128xf32> to vector<2x2x128xf32>
    %c0_4 = arith.constant 0 : index
    %c0_5 = arith.constant 0 : index
    %c0_6 = arith.constant 0 : index
    %c0_7 = arith.constant 0 : index
    %5 = vector.load %arg4[%c0_4, %c0_5, %c0_6, %c0_7] : memref<2x1x2x128xf32, #tpu.memory_space<vmem>>, vector<2x1x2x128xf32>
    %6 = vector.shape_cast %5 : vector<2x1x2x128xf32> to vector<2x2x128xf32>
    %cst = arith.constant 5.000000e-01 : f32
    %7 = vector.broadcast %cst : f32 to vector<2x2x128xf32>
    %8 = arith.cmpf ogt, %6, %7 : vector<2x2x128xf32>
    %cst_8 = arith.constant 0.000000e+00 : f32
    %9 = vector.broadcast %cst_8 : f32 to vector<2x2x128xf32>
    %10 = arith.select %8, %4, %9 : vector<2x2x128xi1>, vector<2x2x128xf32>
    %cst_9 = arith.constant 1.000000e+00 : f32
    %cst_10 = arith.constant 0.000000e+00 : f32
    %11 = vector.broadcast %cst_9 : f32 to vector<2x2x128xf32>
    %12 = vector.broadcast %cst_10 : f32 to vector<2x2x128xf32>
    %13 = arith.select %8, %11, %12 : vector<2x2x128xi1>, vector<2x2x128xf32>
    %14 = arith.addf %4, %13 : vector<2x2x128xf32>
    %c0_11 = arith.constant 0 : index
    %c0_12 = arith.constant 0 : index
    %c0_13 = arith.constant 0 : index
    %c0_14 = arith.constant 0 : index
    %c0_15 = arith.constant 0 : index
    %15 = vector.load %arg5[%c0_11, %c0_12, %c0_13, %c0_14, %c0_15] : memref<1x1x2x8x128xf32, #tpu.memory_space<vmem>>, vector<1x1x1x1x128xf32>
    %16 = vector.shape_cast %15 : vector<1x1x1x1x128xf32> to vector<1x128xf32>
    %cst_16 = arith.constant dense<0.000000e+00> : vector<2x128xf32>
    %17 = vector.multi_reduction <add>, %10, %cst_16 [0] : vector<2x2x128xf32> to vector<2x128xf32>
    %cst_17 = arith.constant dense<0.000000e+00> : vector<128xf32>
    %18 = vector.multi_reduction <add>, %17, %cst_17 [0] : vector<2x128xf32> to vector<128xf32>
    %19 = vector.shape_cast %18 : vector<128xf32> to vector<1x128xf32>
    %20 = arith.addf %16, %19 : vector<1x128xf32>
    %c0_18 = arith.constant 0 : index
    %c0_19 = arith.constant 0 : index
    %c0_20 = arith.constant 0 : index
    %c0_21 = arith.constant 0 : index
    %c0_22 = arith.constant 0 : index
    %21 = vector.load %arg5[%c0_18, %c0_19, %c0_20, %c0_21, %c0_22] : memref<1x1x2x8x128xf32, #tpu.memory_space<vmem>>, vector<1x1x1x1x128xf32>
    %22 = vector.shape_cast %21 : vector<1x1x1x1x128xf32> to vector<1x128xf32>
    %23 = vector.shape_cast %20 : vector<1x128xf32> to vector<1x1x1x1x128xf32>
    tpu.vector_store %arg5[%c0_18, %c0_19, %c0_20, %c0_21, %c0_22], %23 {strides = array<i32>} : memref<1x1x2x8x128xf32, #tpu.memory_space<vmem>>, vector<1x1x1x1x128xf32>,
    %c0_23 = arith.constant 0 : index
    %c0_24 = arith.constant 0 : index
    %c1 = arith.constant 1 : index
    %c0_25 = arith.constant 0 : index
    %c0_26 = arith.constant 0 : index
    %24 = vector.load %arg5[%c0_23, %c0_24, %c1, %c0_25, %c0_26] : memref<1x1x2x8x128xf32, #tpu.memory_space<vmem>>, vector<1x1x1x1x128xf32>
    %25 = vector.shape_cast %24 : vector<1x1x1x1x128xf32> to vector<1x128xf32>
    %cst_27 = arith.constant dense<0.000000e+00> : vector<2x128xf32>
    %26 = vector.multi_reduction <add>, %14, %cst_27 [0] : vector<2x2x128xf32> to vector<2x128xf32>
    %cst_28 = arith.constant dense<0.000000e+00> : vector<128xf32>
    %27 = vector.multi_reduction <add>, %26, %cst_28 [0] : vector<2x128xf32> to vector<128xf32>
    %28 = vector.shape_cast %27 : vector<128xf32> to vector<1x128xf32>
    %29 = arith.addf %25, %28 : vector<1x128xf32>
    %c0_29 = arith.constant 0 : index
    %c0_30 = arith.constant 0 : index
    %c1_31 = arith.constant 1 : index
    %c0_32 = arith.constant 0 : index
    %c0_33 = arith.constant 0 : index
    %30 = vector.load %arg5[%c0_29, %c0_30, %c1_31, %c0_32, %c0_33] : memref<1x1x2x8x128xf32, #tpu.memory_space<vmem>>, vector<1x1x1x1x128xf32>
    %31 = vector.shape_cast %30 : vector<1x1x1x1x128xf32> to vector<1x128xf32>
    %32 = vector.shape_cast %29 : vector<1x128xf32> to vector<1x1x1x1x128xf32>
    tpu.vector_store %arg5[%c0_29, %c0_30, %c1_31, %c0_32, %c0_33], %32 {strides = array<i32>} : memref<1x1x2x8x128xf32, #tpu.memory_space<vmem>>, vector<1x1x1x1x128xf32>,
    return
  }
  func.func @transform_0(%arg0: i32, %arg1: i32, %arg2: i32) -> (i32, i32, i32, i32) {
    %c0_i32 = arith.constant 0 : i32
    %c0_i32_0 = arith.constant 0 : i32
    return %arg1, %arg0, %arg2, %c0_i32 : i32, i32, i32, i32
  }
  func.func @transform_1(%arg0: i32, %arg1: i32, %arg2: i32) -> (i32, i32, i32, i32) {
    %c0_i32 = arith.constant 0 : i32
    %c0_i32_0 = arith.constant 0 : i32
    return %arg1, %arg0, %arg2, %c0_i32 : i32, i32, i32, i32
  }
  func.func @transform_2(%arg0: i32, %arg1: i32, %arg2: i32) -> (i32, i32, i32, i32, i32) {
    %c0_i32 = arith.constant 0 : i32
    %c0_i32_0 = arith.constant 0 : i32
    %c0_i32_1 = arith.constant 0 : i32
    %c0_i32_2 = arith.constant 0 : i32
    return %arg0, %arg1, %c0_i32, %c0_i32_0, %c0_i32_1 : i32, i32, i32, i32, i32
  }
}

</mosaic_0001>

<bundles_post_ra>
// kernel: tpu_custom_call.1
= control target key start
LH: loop header
LB: loop body
LE: loop exit
PB: predicated region body
PF: predicated region fallthrough
CT: control target
= control target key end

     0   :  { %s842_s0 = inlined_call_operand.hbm [shape: f32[2,2,2,128], index: 0, kind: input, shape index: {}]   ;;  %s843_s1 = inlined_call_operand.hbm [shape: f32[2,2,2,128], index: 1, kind: input, shape index: {}]   ;;  %s844_s2 = inlined_call_operand.hbm [shape: f32[2,1,2,8,128], index: 2, kind: output, shape index: {}]  }
   0x1   :  { %845 = sst [smem:[#allocation11_spill]] %s842_s0 }
   0x2   :  { %7 = vsyncpa [#allocation3], 0 }
   0x3   :  { %9 = vsyncpa [#allocation3 + $0x1], 0 }
   0x4   :  { %10 = vsyncpa [#allocation6], 0 }
   0x5   :  { %12 = vsyncpa [#allocation6 + $0x1], 0 }
   0x6   :  { %13 = vsyncpa [#allocation4], 0 }
   0x7   :  { %15 = vsyncpa [#allocation4 + $0x1], 0  ;;  %s685_s9 = smov 0   ;;  %s687_s10 = smov 0  }
   0x8   :  { %s689_s11 = smov 0   ;;  %s691_s12 = smov 0  }
   0x9   :  { %s693_s13 = smov 0   ;;  %s695_s14 = smov 0  }
   0xa LB: > { %s423_s15 = sadd.s32 4294967295, %s662_s14   ;;  %s424_s16 = sadd.s32 4294967294, %s662_s14   ;;  %s662_s14 = sphi %s695_s14, %s21_s14   ;;  %s658_s13 = sphi %s693_s13, %s856_s13   ;;  %s654_s12 = sphi %s691_s12, %s855_s12   ;;  %s650_s11 = sphi %s689_s11, %s854_s11   ;;  %s646_s10 = sphi %s687_s10, %s853_s10   ;;  %s642_s9 = sphi %s685_s9, %s852_s9  }
   0xb   : > { %s40_s17 = sadd.s32 1, %s658_s13  ;;  %s51_s18 = sadd.s32 1, %s650_s11 }
   0xc   : > { %p42_p0 = scmp.ge.s32.totalorder %s40_s17, 2  ;;  %p58_p1 = scmp.ne.s32.totalorder %s650_s11, %s646_s10 }
   0xd   : > { %p59_p2 = scmp.eq.s32.totalorder %s662_s14, 0  ;;  %p64_p3 = scmp.ne.s32.totalorder %s646_s10, %s642_s9 }
   0xe   : > { %s858_s17 = smov (%p42_p0, %s40_s17), 0  ;;  %p65_p5 = scmp.eq.s32.totalorder %s423_s15, 0 }
   0xf   : > { %p726_p4 = por %p59_p2, %p58_p1  ;;  %s45_s20 = ssub.s32 %s658_s13, %s858_s17 }
  0x10   : > { %p120_p6 = scmp.eq.s32.totalorder %s423_s15, 1  ;;  %p49_p7 = scmp.eq.s32.totalorder %s45_s20, 0 }
  0x11   : > { %p732_p8 = por %p65_p5, %p64_p3  ;;  %p126_p10 = scmp.eq.s32.totalorder %s424_s16, 1 }
  0x12   : > { %p736_p9 = por %p120_p6, %p58_p1  ;;  %p426_p12 = scmp.ge.s32.totalorder %s662_s14, 2 }
  0x13   : > { %s741_s23 = scalar_select %p49_p7, %s650_s11, %s51_s18  }
  0x14   : > { %p743_p11 = por %p126_p10, %p64_p3  ;;  %p460_p13 = scmp.lt.s32.totalorder %s662_s14, 2 }
  0x15   : > { %s750_s25 = sand.u32 1, %s650_s11   ;;  %s428_s27 = sshll.u32 %s658_s13, 1 }
  0x16   : > { %s427_s26 = sshll.u32 %s750_s25, 2  ;;  %s850_s0 = sld [smem:[#allocation11_spill]] }
  0x17   : > { %s150_s3 = scalar_lea.vmem [#allocation2], %s427_s26  ;;  %p759_p0 = pnand %p460_p13, %p726_p4 }
  0x18   : > { %s161_s4 = sshll.u32 %s150_s3, 4  ;;  %s147_s7 = scalar_lea.sflag [#allocation3], %s750_s25  ;;  %s162_s4 = int_to_ptr.vmem [resolvable:$true] %s161_s4 }
  0x19   : > { %s664_s8 = smov 64   ;;  %s665_s15 = smov 32  }
  0x1a   : > { %s666_s16 = smov 2   ;;  %p431_p1 = scmp.ge.s32.totalorder %s662_s14, 1 }
  0x1b   : > { %p194_p2 = scmp.lt.s32.totalorder %s662_s14, 3  ;;  %s183_s19 = scalar_lea.hbm %s843_s1, %s428_s27 }
  0x1c   : > { %s158_s30 = scalar_lea.hbm %s850_s0, %s428_s27  ;;  %s184_s28 = sshll.u32 %s183_s19, 4  ;;  %s185_s28 = int_to_ptr.hbm [resolvable:$true] %s184_s28 }
  0x1d   : > { %s159_s5 = sshll.u32 %s158_s30, 4  ;;  %p195_p3 = pnand %p431_p1, %p194_p2  ;;  %s160_s5 = int_to_ptr.hbm [resolvable:$true] %s159_s5 }
  0x1e   : > { %452 = dma.hbm_to_vmem [thread:$0]  (!%p759_p0), %s160_s5, 64, %s162_s4, %s147_s7, %s664_s8, %s665_s15, %s666_s16  }
  0x1f   : > { %s175_s29 = scalar_lea.vmem [#allocation5], %s427_s26  ;;  %s172_s3 = scalar_lea.sflag [#allocation6], %s750_s25 }
  0x20   : > { %s186_s30 = sshll.u32 %s175_s29, 4  ;;  %198 = sbr.rel (%p195_p3) target bundleno = 69 (0x45), region = 28  ;;  %s187_s30 = int_to_ptr.vmem [resolvable:$true] %s186_s30 }
  0x21   : > { %455 = dma.hbm_to_vmem [thread:$0]  (!%p759_p0), %s185_s28, 64, %s187_s30, %s172_s3, %s664_s8, %s665_s15, %s666_s16  }
  0x22   : > { %s775_s0 = sand.u32 (!%p195_p3), 1, %s646_s10  }
  0x23   : > { %s432_s4 = sshll.u32 (!%p195_p3), %s775_s0, 2  ;;  %s201_s5 = scalar_lea.sflag (!%p195_p3), [#allocation3], %s775_s0 }
  0x24   : > { %s204_s7 = scalar_lea.vmem (!%p195_p3), [#allocation2], %s432_s4 }
  0x25   : > { %629 = dma.done.wait (%p732_p8), %s201_s5, 64  }
  0x26   : > { %631 = vsyncadd (%p732_p8), %s201_s5, 4294967232  ;;  %s211_s25 = scalar_lea.sflag [#allocation6], %s775_s0  ;;  %s214_s26 = scalar_lea.vmem [#allocation5], %s432_s4 }
  0x27   : > { %633 = dma.done.wait (%p732_p8), %s211_s25, 64  }
  0x28   : > { %635 = vsyncadd (%p732_p8), %s211_s25, 4294967232  ;;  %s434_s27 = sshll.u32 %s775_s0, 4  ;;  %v667_v0 = vmov 0.0   ;;  %vm262_vm0 = vcmask 1041408   ;;  %v249_v1 = vld [vmem:[%s204_s7] sm:$0x3] }
  0x29   : > { %s789_s6 = scalar_lea.vmem [#allocation7], %s434_s27  ;;  %v250_v2 = vld [vmem:[%s204_s7 + $0x2] sm:$0x3]  ;;  %v251_v3 = vld [vmem:[%s214_s26] sm:$0x3]  ;;  %s442_s21 = sshll.u32 %s654_s12, 4 }
  0x2a   : > { %247 = vst [vmem:[%s789_s6] sm:$0xff] %v667_v0  ;;  %v252_v4 = vld [vmem:[%s214_s26 + $0x2] sm:$0x3]  ;;  %vm253_vm1 = vcmp.gt.f32.partialorder %v251_v3, 0.5  ;;  %s303_s16 = scalar_lea.hbm %s844_s2, %s442_s21  ;;  %s304_s18 = sshll.u32 %s789_s6, 4  ;;  %s305_s18 = int_to_ptr.vmem [resolvable:$true] %s304_s18 }
  0x2b   : > { %248 = vst [vmem:[%s789_s6 + $0x8] sm:$0xff] %v667_v0  ;;  %vm254_vm2 = vcmp.gt.f32.partialorder %v252_v4, 0.5  ;;  %v255_v5 = vsel %vm253_vm1, %v249_v1, 0.0  ;;  %v257_v6 = vsel %vm253_vm1, 1.0, %v667_v0  ;;  %s306_s20 = sshll.u32 %s303_s16, 4  ;;  %s290_s12 = scalar_lea.sflag [#allocation4], %s775_s0  ;;  %s307_s20 = int_to_ptr.hbm [resolvable:$true] %s306_s20 }
  0x2c   : > { %v256_v7 = vsel %vm254_vm2, %v250_v2, 0.0  ;;  %v258_v8 = vsel %vm254_vm2, 1.0, %v667_v0  ;;  %v259_v9 = vadd.f32 %v257_v6, %v249_v1  ;;  %v263_v10 = vsel %vm262_vm0, %v255_v5, 0.0  ;;  %s590_s19 = sshra.s32 %s307_s20, 4  ;;  %s596_s3 = scalar_lea.hbm %s844_s2, 32  ;;  %s591_s19 = int_to_ptr.hbm [resolvable:$true] %s590_s19 }
  0x2d   : > { %v260_v11 = vadd.f32 %v258_v8, %v250_v2  ;;  %v264_v12 = vsel %vm262_vm0, %v256_v7, 0.0  ;;  %s592_s28 = scalar_lea.hbm %s591_s19, 16  ;;  %p597_p7 = scmp.lt.s32.totalorder %s591_s19, %s844_s2 }
  0x2e   : > { %v265_v13 = vadd.f32 %v264_v12, %v263_v10  ;;  %v277_v14 = vsel %vm262_vm0, %v259_v9, 0.0  ;;  %p593_p4 = scmp.ne.s32.totalorder %s591_s19, %s592_s28  ;;  %p598_p8 = scmp.lt.s32.totalorder %s596_s3, %s592_s28 }
  0x2f   : > { %v278_v15 = vsel %vm262_vm0, %v260_v11, 0.0 }
  0x30   : > { %v266_v16 = vsel %vm262_vm0, %v265_v13, 0.0  ;;  %v279_v17 = vadd.f32 %v278_v15, %v277_v14  ;;  %p594_p5 = pnand %p593_p4, %p736_p9  ;;  %p599_p10 = por %p598_p8, %p597_p7 }
  0x31   : > { %v267_v18 = vrot.slane %v266_v16, 4  ;;  %v261_v28 = vld [vmem:[%s789_s6] sm:$0x1] }
  0x32   : > { %v280_v19 = vsel %vm262_vm0, %v279_v17, 0.0  ;;  %v435_v31 = vld [vmem:[%s789_s6 + $0x8] sm:$0x1]  ;;  %p595_p6 = pneg %p594_p5 }
  0x33   : > { %v281_v20 = vrot.slane %v280_v19, 4  ;;  %v268_v21 = vadd.f32 %v267_v18, %v266_v16 }
  0x34   : > { %p600_p13 = pnand %p599_p10, %p595_p6 }
  0x35   : > { %v269_v22 = vrot.slane %v268_v21, 2  ;;  %v282_v23 = vadd.f32 %v281_v20, %v280_v19 }
  0x37   : > { %v270_v24 = vadd.f32 %v269_v22, %v268_v21  ;;  %v283_v25 = vrot.slane %v282_v23, 2 }
  0x39   : > { %v271_v26 = vrot.slane %v270_v24, 1  ;;  %v284_v27 = vadd.f32 %v283_v25, %v282_v23 }
  0x3b   : > { %v272_v29 = vadd.f32 %v271_v26, %v270_v24  ;;  %v285_v30 = vrot.slane %v284_v27, 1 }
  0x3d   : > { %v273_v32 = vadd.f32 %v272_v29, %v261_v28  ;;  %v286_v33 = vadd.f32 %v285_v30, %v284_v27 }
  0x3f   : > { %274 = vst [vmem:[%s789_s6] sm:$0x1] %v273_v32  ;;  %v287_v34 = vadd.f32 %v435_v31, %v286_v33 }
  0x41   : > { %436 = vst [vmem:[%s789_s6 + $0x8] sm:$0x1] %v287_v34 }
  0x42   : > { %603 = shalt.err (!%p600_p13)
}
  0x43   : > { %s668_s0 = smov 128   ;;  %s669_s7 = smov 8  }
  0x44   : > { %447 = dma.vmem_to_hbm [thread:$0]  (%p736_p9), %s305_s18, 256, %s307_s20, %s290_s12, %s668_s0, %s668_s0, %s669_s7  }
  0x45 PF: > { %s321_s25 = sand.u32 1, %s642_s9   ;;  %p457_p0 = pnand %p426_p12, %p743_p11 }
  0x46   : > { %s322_s26 = scalar_lea.sflag [#allocation4], %s321_s25 }
  0x47   : > { %p458_p1 = pneg %p457_p0 }
  0x49   : > { %637 = dma.done.wait (%p458_p1), %s322_s26, 256  }
  0x4a   : > { %639 = vsyncadd (%p458_p1), %s322_s26, 4294967040  ;;  %s21_s14 = sadd.s32 1, %s662_s14   ;;  %s852_s9 = smov %s646_s10 }
  0x4b   : > { %p18_p2 = scmp.ge.s32.totalorder %s21_s14, 4   ;;  %s853_s10 = smov %s650_s11 }
  0x4c   : > { %s854_s11 = smov %s741_s23  ;;  %s855_s12 = smov %s658_s13 }
  0x4d   : > { %s856_s13 = smov %s858_s17  ;;  %20 = sbr.rel (!%p18_p2) target bundleno = 10 (0xa), region = 91 }
  0x52   :  { %328 = vsyncpa [#allocation3], 1 }
  0x53   :  { %330 = vsyncpa [#allocation3 + $0x1], 1 }
  0x54   :  { %331 = vsyncpa [#allocation6], 1 }
  0x55   :  { %333 = vsyncpa [#allocation6 + $0x1], 1 }
  0x56   :  { %334 = vsyncpa [#allocation4], 1 }
  0x57   :  { %336 = vsyncpa [#allocation4 + $0x1], 1 }

</bundles_post_ra>
